<compile_context>
chip_gen: v6e
topology: v6e:2x2x1
jax: 0.10.0
libtpu: 0.0.40
codegen_flags: <defaults>
</compile_context>

<pallas_src>
import jax
import jax.numpy as jnp
from jax.experimental import pallas as pl
from jax.experimental.pallas import tpu as pltpu


_SPLIT_K_THRESHOLD = 512  # use the single fused dot when D = E + 2H < this


# --------------------------------------------------------------------------- #
# Kernels
# --------------------------------------------------------------------------- #
def _merge_kernel_fused(node_ref, s1_ref, s2_ref, w_ref, b_ref, o_ref):
    """Single MXU dot over the concatenated input (small D = E + 2H)."""
    hp = o_ref.shape[-1]  # lane-aligned per-gate width
    x = jnp.concatenate([node_ref[...], s1_ref[...], s2_ref[...]], axis=-1)
    x = x.astype(w_ref.dtype)  # in-kernel cast (bf16 compute path)
    acc = jnp.dot(x, w_ref[...], preferred_element_type=jnp.float32)
    acc = acc + b_ref[...].astype(jnp.float32)
    h = jnp.tanh(acc[:, :hp])
    # sigmoid(z) = 0.5 * tanh(0.5 * z) + 0.5  -> one EUP op instead of exp+recip
    g = 0.5 * jnp.tanh(0.5 * acc[:, hp:]) + 0.5
    o_ref[...] = (h * g).astype(o_ref.dtype)


def _merge_kernel_split(node_ref, s1_ref, s2_ref, wn_ref, w1_ref, w2_ref,
                        b_ref, o_ref):
    """Three row-split dots (large D): avoids materializing the concat."""
    hp = o_ref.shape[-1]
    cdt = wn_ref.dtype
    acc = jnp.dot(node_ref[...].astype(cdt), wn_ref[...],
                  preferred_element_type=jnp.float32)
    acc = acc + jnp.dot(s1_ref[...].astype(cdt), w1_ref[...],
                        preferred_element_type=jnp.float32)
    acc = acc + jnp.dot(s2_ref[...].astype(cdt), w2_ref[...],
                        preferred_element_type=jnp.float32)
    acc = acc + b_ref[...].astype(jnp.float32)
    h = jnp.tanh(acc[:, :hp])
    g = 0.5 * jnp.tanh(0.5 * acc[:, hp:]) + 0.5
    o_ref[...] = (h * g).astype(o_ref.dtype)


# --------------------------------------------------------------------------- #
# Helpers
# --------------------------------------------------------------------------- #
def _round_up(x, m):
    return ((x + m - 1) // m) * m


def _sublane_granularity(*dtypes):
    """Row-tile granularity: 8 for f32, 16 for bf16, 32 for int8 (packing)."""
    itemsize = min(jnp.dtype(d).itemsize for d in dtypes)
    return max(8, 32 // max(itemsize, 1))


def _pick_row_tile(B, D, Hp, in_itemsize, out_itemsize, weight_bytes,
                   granularity, budget):
    """Largest row tile (multiple of granularity) fitting the VMEM budget."""
    # Per-row cost: double-buffered activations + output, f32 (tm, 2*Hp)
    # pre-activation and (worst case f32) (tm, D) concatenated input.
    per_row = (2 * D * in_itemsize + 2 * Hp * out_itemsize
               + 2 * Hp * 4 + D * 4)
    avail = max(budget - weight_bytes, per_row * granularity)
    tm = min(1024, avail // per_row)
    tm = max(granularity, (tm // granularity) * granularity)
    tm = min(tm, _round_up(B, granularity))
    return int(tm)


def pack_merge_params(params, embedding_size, compute_dtype=None):
    """One-time packing: fuse merge/merge_g and lane-align each gate's columns.

    params: w_merge (D, H), b_merge (H,), w_merge_g (D, H), b_merge_g (H,),
            weights stored (in, out) with D = embedding_size + 2 * H.
    Each gate's output columns are zero-padded to Hp = round_up(H, 128) so the
    tanh/sigmoid split and the output store are whole-vreg lane-aligned.
    """
    H = params["w_merge"].shape[1]
    E = embedding_size
    D = E + 2 * H
    assert params["w_merge"].shape == (D, H)
    Hp = _round_up(H, 128)
    colpad = ((0, 0), (0, Hp - H))
    w = jnp.concatenate([jnp.pad(params["w_merge"], colpad),
                         jnp.pad(params["w_merge_g"], colpad)], axis=1)  # (D, 2Hp)
    b = jnp.concatenate([jnp.pad(params["b_merge"], (0, Hp - H)),
                         jnp.pad(params["b_merge_g"], (0, Hp - H))])
    b = b.reshape(1, 2 * Hp).astype(jnp.float32)  # bias / epilogue stay f32
    if compute_dtype is not None:
        w = w.astype(compute_dtype)
    return {"w": w, "b": b, "hidden_size": H, "embedding_size": E,
            "padded_hidden": Hp}


# --------------------------------------------------------------------------- #
# Forward
# --------------------------------------------------------------------------- #
def merge_forward(node_embedding, sub_tree_1, sub_tree_2, packed):
    """Pallas-backed forward of Merge (inference).

    node_embedding: (B, E), sub_tree_1/2: (B, H); `packed` from
    pack_merge_params.  Intentionally NOT wrapped in jax.jit so the
    buffering/kernel fallbacks below can catch lowering errors of the
    eagerly-dispatched pallas_call.
    """
    B, E = node_embedding.shape
    H = packed["hidden_size"]
    Hp = packed["padded_hidden"]
    D = E + 2 * H
    out_dtype = node_embedding.dtype
    w, b = packed["w"], packed["b"]
    cdt = w.dtype

    in_isz = jnp.dtype(node_embedding.dtype).itemsize
    out_isz = jnp.dtype(out_dtype).itemsize
    w_isz = jnp.dtype(cdt).itemsize
    gran = _sublane_granularity(node_embedding.dtype, cdt, out_dtype)

    # --- generation-aware VMEM budget ------------------------------------- #
    try:
        vmem_cap = int(pltpu.get_tpu_info().vmem_capacity_bytes)
    except Exception:
        vmem_cap = 64 * 1024 * 1024  # conservative: v7x per-core VMEM
    weight_bytes = 2 * (D * 2 * Hp * w_isz + 2 * Hp * 4)  # worst case 2 buffers
    tm = _pick_row_tile(B, D, Hp, in_isz, out_isz, weight_bytes, gran,
                        budget=int(0.45 * vmem_cap))
    B_pad = _round_up(B, tm)
    grid = (B_pad // tm,)

    # Pad B so every grid step is a full tile (keeps pipelining + megacore
    # split alive for ragged batches); padded rows are sliced off afterwards.
    if B_pad != B:
        pad = ((0, B_pad - B), (0, 0))
        node = jnp.pad(node_embedding, pad)
        s1 = jnp.pad(sub_tree_1, pad)
        s2 = jnp.pad(sub_tree_2, pad)
    else:
        node, s1, s2 = node_embedding, sub_tree_1, sub_tree_2

    cost = pl.CostEstimate(
        flops=int(2 * B_pad * D * 2 * Hp + 8 * B_pad * Hp),
        transcendentals=int(2 * B_pad * Hp),
        bytes_accessed=int(B_pad * (D * in_isz + Hp * out_isz)
                           + D * 2 * Hp * w_isz + 2 * Hp * 4),
    )
    compiler_params = pltpu.CompilerParams(
        dimension_semantics=("parallel",),        # megacore split over B tiles
        vmem_limit_bytes=int(0.7 * vmem_cap),     # raise v5e/v7x scoped defaults
    )

    def build(use_fused, single_buffer_weights):
        # Resident (constant-index) blocks: request single buffering to halve
        # their VMEM footprint; fall back to default if unsupported.
        const = ({"pipeline_mode": pl.Buffered(1)}
                 if single_buffer_weights else {})
        row_in = [
            pl.BlockSpec((tm, E), lambda i: (i, 0)),
            pl.BlockSpec((tm, H), lambda i: (i, 0)),
            pl.BlockSpec((tm, H), lambda i: (i, 0)),
        ]
        if use_fused:
            kernel = _merge_kernel_fused
            in_specs = row_in + [
                pl.BlockSpec((D, 2 * Hp), lambda i: (0, 0), **const),
                pl.BlockSpec((1, 2 * Hp), lambda i: (0, 0), **const),
            ]
            args = (node, s1, s2, w, b)
        else:
            kernel = _merge_kernel_split
            in_specs = row_in + [
                pl.BlockSpec((E, 2 * Hp), lambda i: (0, 0), **const),
                pl.BlockSpec((H, 2 * Hp), lambda i: (0, 0), **const),
                pl.BlockSpec((H, 2 * Hp), lambda i: (0, 0), **const),
                pl.BlockSpec((1, 2 * Hp), lambda i: (0, 0), **const),
            ]
            args = (node, s1, s2, w[:E], w[E:E + H], w[E + H:], b)
        call = pl.pallas_call(
            kernel,
            out_shape=jax.ShapeDtypeStruct((B_pad, Hp), out_dtype),
            grid_spec=pltpu.PrefetchScalarGridSpec(
                num_scalar_prefetch=0,
                grid=grid,
                in_specs=in_specs,
                out_specs=pl.BlockSpec((tm, Hp), lambda i: (i, 0)),
            ),
            compiler_params=compiler_params,
            cost_estimate=cost,
        )
        return call, args

    fused_ok = D < _SPLIT_K_THRESHOLD
    attempts = ([(True, True), (True, False), (False, False)] if fused_ok
                else [(False, True), (False, False)])
    out, last_err = None, None
    for use_fused, single_buf in attempts:
        try:
            call, args = build(use_fused, single_buf)
            out = call(*args)
            break
        except Exception as e:  # fall back to a more conservative config
            last_err = e
    if out is None:
        raise last_err

    if B_pad != B or Hp != H:
        out = out[:B, :H]
    return out


# --------------------------------------------------------------------------- #
# Reference + init (for the self-test)
# --------------------------------------------------------------------------- #
def init_merge_params(key, hidden_size, embedding_size, dtype=jnp.float32):
    """Deterministic init mimicking nn.Linear (uniform +/- 1/sqrt(in_features))."""
    D = hidden_size * 2 + embedding_size
    bound = 1.0 / jnp.sqrt(jnp.array(D, dtype=jnp.float32))
    k1, k2, k3, k4 = jax.random.split(key, 4)
    return {
        # stored transposed relative to PyTorch's (out, in): shape (in, out)
        "w_merge": jax.random.uniform(k1, (D, hidden_size), dtype, -bound, bound),
        "b_merge": jax.random.uniform(k2, (hidden_size,), dtype, -bound, bound),
        "w_merge_g": jax.random.uniform(k3, (D, hidden_size), dtype, -bound, bound),
        "b_merge_g": jax.random.uniform(k4, (hidden_size,), dtype, -bound, bound),
    }


def merge_reference(node_embedding, sub_tree_1, sub_tree_2, params):
    """Pure-JAX reference (matches the PyTorch module at inference)."""
    x = jnp.concatenate([node_embedding, sub_tree_1, sub_tree_2], axis=1)
    s = jnp.tanh(x @ params["w_merge"] + params["b_merge"])
    g = jax.nn.sigmoid(x @ params["w_merge_g"] + params["b_merge_g"])
    return s * g


if __name__ == "__main__":
    B = 8
    hidden_size = 32
    embedding_size = 32

    key = jax.random.PRNGKey(0)
    kp, kn, k1, k2 = jax.random.split(key, 4)

    params = init_merge_params(kp, hidden_size, embedding_size)
    node_embedding = jax.random.normal(kn, (B, embedding_size), jnp.float32)
    sub_tree_1 = jax.random.normal(k1, (B, hidden_size), jnp.float32)
    sub_tree_2 = jax.random.normal(k2, (B, hidden_size), jnp.float32)

    # One-time packing (fused + lane-aligned gate weights); f32 compute path.
    packed = pack_merge_params(params, embedding_size)

    out = merge_forward(node_embedding, sub_tree_1, sub_tree_2, packed)
    out = jax.block_until_ready(out)

    ref = merge_reference(node_embedding, sub_tree_1, sub_tree_2, params)
    assert out.shape == (B, hidden_size)
    assert jnp.allclose(out, ref, atol=1e-5, rtol=1e-5), float(
        jnp.max(jnp.abs(out - ref)))

    print("KERNEL_OK")
</pallas_src>

<mosaic_0001>
module attributes {stable_mosaic.version = 11 : i64} {
  func.func @_merge_kernel_fused(%arg0: i32, %arg1: memref<8x32xf32, #tpu.memory_space<vmem>>, %arg2: memref<8x32xf32, #tpu.memory_space<vmem>>, %arg3: memref<8x32xf32, #tpu.memory_space<vmem>>, %arg4: memref<96x256xf32, #tpu.memory_space<vmem>>, %arg5: memref<1x256xf32, #tpu.memory_space<vmem>>, %arg6: memref<8x128xf32, #tpu.memory_space<vmem>>) attributes {dimension_semantics = [#tpu.dimension_semantics<parallel>], iteration_bounds = array<i64: 1>, scalar_prefetch = 0 : i64, scratch_operands = 0 : i64, tpu.core_type = #tpu.core_type<tc>, window_params = [{transform_indices = @transform_0, window_bounds = array<i64: 8, 32>}, {transform_indices = @transform_1, window_bounds = array<i64: 8, 32>}, {transform_indices = @transform_2, window_bounds = array<i64: 8, 32>}, {pipeline_mode = #tpu.pipeline_mode<synchronous>, transform_indices = @transform_3, window_bounds = array<i64: 96, 256>}, {pipeline_mode = #tpu.pipeline_mode<synchronous>, transform_indices = @transform_4, window_bounds = array<i64: 1, 256>}, {transform_indices = @transform_5, window_bounds = array<i64: 8, 128>}]} {
    %c0 = arith.constant 0 : index
    %c0_0 = arith.constant 0 : index
    %0 = vector.load %arg1[%c0, %c0_0] : memref<8x32xf32, #tpu.memory_space<vmem>>, vector<8x32xf32>
    %c0_1 = arith.constant 0 : index
    %c0_2 = arith.constant 0 : index
    %1 = vector.load %arg2[%c0_1, %c0_2] : memref<8x32xf32, #tpu.memory_space<vmem>>, vector<8x32xf32>
    %c0_3 = arith.constant 0 : index
    %c0_4 = arith.constant 0 : index
    %2 = vector.load %arg3[%c0_3, %c0_4] : memref<8x32xf32, #tpu.memory_space<vmem>>, vector<8x32xf32>
    %3 = tpu.concatenate %0, %1, %2 in 1 : vector<8x32xf32>, vector<8x32xf32>, vector<8x32xf32> -> vector<8x96xf32>
    %c0_5 = arith.constant 0 : index
    %c0_6 = arith.constant 0 : index
    %4 = vector.load %arg4[%c0_5, %c0_6] : memref<96x256xf32, #tpu.memory_space<vmem>>, vector<96x256xf32>
    %cst = arith.constant dense<0.000000e+00> : vector<8x256xf32>
    %5 = tpu.matmul %3, %4, %cst {dimension_numbers = #tpu.dot_dimension_numbers<[1], [0], [0], [1], [0, 0, 1, 1], [], []>} : vector<8x96xf32>, vector<96x256xf32>, vector<8x256xf32> -> vector<8x256xf32>
    %c0_7 = arith.constant 0 : index
    %c0_8 = arith.constant 0 : index
    %6 = vector.load %arg5[%c0_7, %c0_8] : memref<1x256xf32, #tpu.memory_space<vmem>>, vector<1x256xf32>
    %7 = vector.broadcast %6 : vector<1x256xf32> to vector<8x256xf32>
    %8 = arith.addf %5, %7 : vector<8x256xf32>
    %9 = vector.extract_strided_slice %8 {offsets = [0, 0], sizes = [8, 128], strides = [1, 1]} : vector<8x256xf32> to vector<8x128xf32>
    %10 = math.tanh %9 : vector<8x128xf32>
    %11 = vector.extract_strided_slice %8 {offsets = [0, 128], sizes = [8, 128], strides = [1, 1]} : vector<8x256xf32> to vector<8x128xf32>
    %cst_9 = arith.constant 5.000000e-01 : f32
    %12 = vector.broadcast %cst_9 : f32 to vector<8x128xf32>
    %13 = arith.mulf %12, %11 : vector<8x128xf32>
    %14 = math.tanh %13 : vector<8x128xf32>
    %cst_10 = arith.constant 5.000000e-01 : f32
    %15 = vector.broadcast %cst_10 : f32 to vector<8x128xf32>
    %16 = arith.mulf %15, %14 : vector<8x128xf32>
    %cst_11 = arith.constant 5.000000e-01 : f32
    %17 = vector.broadcast %cst_11 : f32 to vector<8x128xf32>
    %18 = arith.addf %16, %17 : vector<8x128xf32>
    %19 = arith.mulf %10, %18 : vector<8x128xf32>
    %c0_12 = arith.constant 0 : index
    %c0_13 = arith.constant 0 : index
    %20 = vector.load %arg6[%c0_12, %c0_13] : memref<8x128xf32, #tpu.memory_space<vmem>>, vector<8x128xf32>
    tpu.vector_store %arg6[%c0_12, %c0_13], %19 {strides = array<i32>} : memref<8x128xf32, #tpu.memory_space<vmem>>, vector<8x128xf32>,
    return
  }
  func.func @transform_0(%arg0: i32) -> (i32, i32) {
    %c0_i32 = arith.constant 0 : i32
    %c0_i32_0 = arith.constant 0 : i32
    return %arg0, %c0_i32 : i32, i32
  }
  func.func @transform_1(%arg0: i32) -> (i32, i32) {
    %c0_i32 = arith.constant 0 : i32
    %c0_i32_0 = arith.constant 0 : i32
    return %arg0, %c0_i32 : i32, i32
  }
  func.func @transform_2(%arg0: i32) -> (i32, i32) {
    %c0_i32 = arith.constant 0 : i32
    %c0_i32_0 = arith.constant 0 : i32
    return %arg0, %c0_i32 : i32, i32
  }
  func.func @transform_3(%arg0: i32) -> (i32, i32) {
    %c0_i32 = arith.constant 0 : i32
    %c0_i32_0 = arith.constant 0 : i32
    %c0_i32_1 = arith.constant 0 : i32
    return %c0_i32, %c0_i32_0 : i32, i32
  }
  func.func @transform_4(%arg0: i32) -> (i32, i32) {
    %c0_i32 = arith.constant 0 : i32
    %c0_i32_0 = arith.constant 0 : i32
    %c0_i32_1 = arith.constant 0 : i32
    return %c0_i32, %c0_i32_0 : i32, i32
  }
  func.func @transform_5(%arg0: i32) -> (i32, i32) {
    %c0_i32 = arith.constant 0 : i32
    %c0_i32_0 = arith.constant 0 : i32
    return %arg0, %c0_i32 : i32, i32
  }
}

module attributes {stable_mosaic.version = 11 : i64} {
  func.func @_merge_kernel_fused(%arg0: i32, %arg1: memref<8x32xf32, #tpu.memory_space<vmem>>, %arg2: memref<8x32xf32, #tpu.memory_space<vmem>>, %arg3: memref<8x32xf32, #tpu.memory_space<vmem>>, %arg4: memref<96x256xf32, #tpu.memory_space<vmem>>, %arg5: memref<1x256xf32, #tpu.memory_space<vmem>>, %arg6: memref<8x128xf32, #tpu.memory_space<vmem>>) attributes {dimension_semantics = [#tpu.dimension_semantics<parallel>], iteration_bounds = array<i64: 1>, scalar_prefetch = 0 : i64, scratch_operands = 0 : i64, tpu.core_type = #tpu.core_type<tc>, window_params = [{transform_indices = @transform_0, window_bounds = array<i64: 8, 32>}, {transform_indices = @transform_1, window_bounds = array<i64: 8, 32>}, {transform_indices = @transform_2, window_bounds = array<i64: 8, 32>}, {pipeline_mode = #tpu.pipeline_mode<synchronous>, transform_indices = @transform_3, window_bounds = array<i64: 96, 256>}, {pipeline_mode = #tpu.pipeline_mode<synchronous>, transform_indices = @transform_4, window_bounds = array<i64: 1, 256>}, {transform_indices = @transform_5, window_bounds = array<i64: 8, 128>}]} {
    %c0 = arith.constant 0 : index
    %c0_0 = arith.constant 0 : index
    %0 = vector.load %arg1[%c0, %c0_0] : memref<8x32xf32, #tpu.memory_space<vmem>>, vector<8x32xf32>
    %c0_1 = arith.constant 0 : index
    %c0_2 = arith.constant 0 : index
    %1 = vector.load %arg2[%c0_1, %c0_2] : memref<8x32xf32, #tpu.memory_space<vmem>>, vector<8x32xf32>
    %c0_3 = arith.constant 0 : index
    %c0_4 = arith.constant 0 : index
    %2 = vector.load %arg3[%c0_3, %c0_4] : memref<8x32xf32, #tpu.memory_space<vmem>>, vector<8x32xf32>
    %3 = tpu.concatenate %0, %1, %2 in 1 : vector<8x32xf32>, vector<8x32xf32>, vector<8x32xf32> -> vector<8x96xf32>
    %c0_5 = arith.constant 0 : index
    %c0_6 = arith.constant 0 : index
    %4 = vector.load %arg4[%c0_5, %c0_6] : memref<96x256xf32, #tpu.memory_space<vmem>>, vector<96x256xf32>
    %cst = arith.constant dense<0.000000e+00> : vector<8x256xf32>
    %5 = tpu.matmul %3, %4, %cst {dimension_numbers = #tpu.dot_dimension_numbers<[1], [0], [0], [1], [0, 0, 1, 1], [], []>} : vector<8x96xf32>, vector<96x256xf32>, vector<8x256xf32> -> vector<8x256xf32>
    %c0_7 = arith.constant 0 : index
    %c0_8 = arith.constant 0 : index
    %6 = vector.load %arg5[%c0_7, %c0_8] : memref<1x256xf32, #tpu.memory_space<vmem>>, vector<1x256xf32>
    %7 = vector.broadcast %6 : vector<1x256xf32> to vector<8x256xf32>
    %8 = arith.addf %5, %7 : vector<8x256xf32>
    %9 = vector.extract_strided_slice %8 {offsets = [0, 0], sizes = [8, 128], strides = [1, 1]} : vector<8x256xf32> to vector<8x128xf32>
    %10 = math.tanh %9 : vector<8x128xf32>
    %11 = vector.extract_strided_slice %8 {offsets = [0, 128], sizes = [8, 128], strides = [1, 1]} : vector<8x256xf32> to vector<8x128xf32>
    %cst_9 = arith.constant 5.000000e-01 : f32
    %12 = vector.broadcast %cst_9 : f32 to vector<8x128xf32>
    %13 = arith.mulf %12, %11 : vector<8x128xf32>
    %14 = math.tanh %13 : vector<8x128xf32>
    %cst_10 = arith.constant 5.000000e-01 : f32
    %15 = vector.broadcast %cst_10 : f32 to vector<8x128xf32>
    %16 = arith.mulf %15, %14 : vector<8x128xf32>
    %cst_11 = arith.constant 5.000000e-01 : f32
    %17 = vector.broadcast %cst_11 : f32 to vector<8x128xf32>
    %18 = arith.addf %16, %17 : vector<8x128xf32>
    %19 = arith.mulf %10, %18 : vector<8x128xf32>
    %c0_12 = arith.constant 0 : index
    %c0_13 = arith.constant 0 : index
    %20 = vector.load %arg6[%c0_12, %c0_13] : memref<8x128xf32, #tpu.memory_space<vmem>>, vector<8x128xf32>
    tpu.vector_store %arg6[%c0_12, %c0_13], %19 {strides = array<i32>} : memref<8x128xf32, #tpu.memory_space<vmem>>, vector<8x128xf32>,
    return
  }
  func.func @transform_0(%arg0: i32) -> (i32, i32) {
    %c0_i32 = arith.constant 0 : i32
    %c0_i32_0 = arith.constant 0 : i32
    return %arg0, %c0_i32 : i32, i32
  }
  func.func @transform_1(%arg0: i32) -> (i32, i32) {
    %c0_i32 = arith.constant 0 : i32
    %c0_i32_0 = arith.constant 0 : i32
    return %arg0, %c0_i32 : i32, i32
  }
  func.func @transform_2(%arg0: i32) -> (i32, i32) {
    %c0_i32 = arith.constant 0 : i32
    %c0_i32_0 = arith.constant 0 : i32
    return %arg0, %c0_i32 : i32, i32
  }
  func.func @transform_3(%arg0: i32) -> (i32, i32) {
    %c0_i32 = arith.constant 0 : i32
    %c0_i32_0 = arith.constant 0 : i32
    %c0_i32_1 = arith.constant 0 : i32
    return %c0_i32, %c0_i32_0 : i32, i32
  }
  func.func @transform_4(%arg0: i32) -> (i32, i32) {
    %c0_i32 = arith.constant 0 : i32
    %c0_i32_0 = arith.constant 0 : i32
    %c0_i32_1 = arith.constant 0 : i32
    return %c0_i32, %c0_i32_0 : i32, i32
  }
  func.func @transform_5(%arg0: i32) -> (i32, i32) {
    %c0_i32 = arith.constant 0 : i32
    %c0_i32_0 = arith.constant 0 : i32
    return %arg0, %c0_i32 : i32, i32
  }
}

module attributes {stable_mosaic.version = 11 : i64} {
  func.func @_merge_kernel_split(%arg0: i32, %arg1: memref<8x32xf32, #tpu.memory_space<vmem>>, %arg2: memref<8x32xf32, #tpu.memory_space<vmem>>, %arg3: memref<8x32xf32, #tpu.memory_space<vmem>>, %arg4: memref<32x256xf32, #tpu.memory_space<vmem>>, %arg5: memref<32x256xf32, #tpu.memory_space<vmem>>, %arg6: memref<32x256xf32, #tpu.memory_space<vmem>>, %arg7: memref<1x256xf32, #tpu.memory_space<vmem>>, %arg8: memref<8x128xf32, #tpu.memory_space<vmem>>) attributes {dimension_semantics = [#tpu.dimension_semantics<parallel>], iteration_bounds = array<i64: 1>, scalar_prefetch = 0 : i64, scratch_operands = 0 : i64, tpu.core_type = #tpu.core_type<tc>, window_params = [{transform_indices = @transform_0, window_bounds = array<i64: 8, 32>}, {transform_indices = @transform_1, window_bounds = array<i64: 8, 32>}, {transform_indices = @transform_2, window_bounds = array<i64: 8, 32>}, {pipeline_mode = #tpu.pipeline_mode<synchronous>, transform_indices = @transform_3, window_bounds = array<i64: 32, 256>}, {pipeline_mode = #tpu.pipeline_mode<synchronous>, transform_indices = @transform_4, window_bounds = array<i64: 32, 256>}, {pipeline_mode = #tpu.pipeline_mode<synchronous>, transform_indices = @transform_5, window_bounds = array<i64: 32, 256>}, {pipeline_mode = #tpu.pipeline_mode<synchronous>, transform_indices = @transform_6, window_bounds = array<i64: 1, 256>}, {transform_indices = @transform_7, window_bounds = array<i64: 8, 128>}]} {
    %c0 = arith.constant 0 : index
    %c0_0 = arith.constant 0 : index
    %0 = vector.load %arg1[%c0, %c0_0] : memref<8x32xf32, #tpu.memory_space<vmem>>, vector<8x32xf32>
    %c0_1 = arith.constant 0 : index
    %c0_2 = arith.constant 0 : index
    %1 = vector.load %arg4[%c0_1, %c0_2] : memref<32x256xf32, #tpu.memory_space<vmem>>, vector<32x256xf32>
    %cst = arith.constant dense<0.000000e+00> : vector<8x256xf32>
    %2 = tpu.matmul %0, %1, %cst {dimension_numbers = #tpu.dot_dimension_numbers<[1], [0], [0], [1], [0, 0, 1, 1], [], []>} : vector<8x32xf32>, vector<32x256xf32>, vector<8x256xf32> -> vector<8x256xf32>
    %c0_3 = arith.constant 0 : index
    %c0_4 = arith.constant 0 : index
    %3 = vector.load %arg2[%c0_3, %c0_4] : memref<8x32xf32, #tpu.memory_space<vmem>>, vector<8x32xf32>
    %c0_5 = arith.constant 0 : index
    %c0_6 = arith.constant 0 : index
    %4 = vector.load %arg5[%c0_5, %c0_6] : memref<32x256xf32, #tpu.memory_space<vmem>>, vector<32x256xf32>
    %cst_7 = arith.constant dense<0.000000e+00> : vector<8x256xf32>
    %5 = tpu.matmul %3, %4, %cst_7 {dimension_numbers = #tpu.dot_dimension_numbers<[1], [0], [0], [1], [0, 0, 1, 1], [], []>} : vector<8x32xf32>, vector<32x256xf32>, vector<8x256xf32> -> vector<8x256xf32>
    %6 = arith.addf %2, %5 : vector<8x256xf32>
    %c0_8 = arith.constant 0 : index
    %c0_9 = arith.constant 0 : index
    %7 = vector.load %arg3[%c0_8, %c0_9] : memref<8x32xf32, #tpu.memory_space<vmem>>, vector<8x32xf32>
    %c0_10 = arith.constant 0 : index
    %c0_11 = arith.constant 0 : index
    %8 = vector.load %arg6[%c0_10, %c0_11] : memref<32x256xf32, #tpu.memory_space<vmem>>, vector<32x256xf32>
    %cst_12 = arith.constant dense<0.000000e+00> : vector<8x256xf32>
    %9 = tpu.matmul %7, %8, %cst_12 {dimension_numbers = #tpu.dot_dimension_numbers<[1], [0], [0], [1], [0, 0, 1, 1], [], []>} : vector<8x32xf32>, vector<32x256xf32>, vector<8x256xf32> -> vector<8x256xf32>
    %10 = arith.addf %6, %9 : vector<8x256xf32>
    %c0_13 = arith.constant 0 : index
    %c0_14 = arith.constant 0 : index
    %11 = vector.load %arg7[%c0_13, %c0_14] : memref<1x256xf32, #tpu.memory_space<vmem>>, vector<1x256xf32>
    %12 = vector.broadcast %11 : vector<1x256xf32> to vector<8x256xf32>
    %13 = arith.addf %10, %12 : vector<8x256xf32>
    %14 = vector.extract_strided_slice %13 {offsets = [0, 0], sizes = [8, 128], strides = [1, 1]} : vector<8x256xf32> to vector<8x128xf32>
    %15 = math.tanh %14 : vector<8x128xf32>
    %16 = vector.extract_strided_slice %13 {offsets = [0, 128], sizes = [8, 128], strides = [1, 1]} : vector<8x256xf32> to vector<8x128xf32>
    %cst_15 = arith.constant 5.000000e-01 : f32
    %17 = vector.broadcast %cst_15 : f32 to vector<8x128xf32>
    %18 = arith.mulf %17, %16 : vector<8x128xf32>
    %19 = math.tanh %18 : vector<8x128xf32>
    %cst_16 = arith.constant 5.000000e-01 : f32
    %20 = vector.broadcast %cst_16 : f32 to vector<8x128xf32>
    %21 = arith.mulf %20, %19 : vector<8x128xf32>
    %cst_17 = arith.constant 5.000000e-01 : f32
    %22 = vector.broadcast %cst_17 : f32 to vector<8x128xf32>
    %23 = arith.addf %21, %22 : vector<8x128xf32>
    %24 = arith.mulf %15, %23 : vector<8x128xf32>
    %c0_18 = arith.constant 0 : index
    %c0_19 = arith.constant 0 : index
    %25 = vector.load %arg8[%c0_18, %c0_19] : memref<8x128xf32, #tpu.memory_space<vmem>>, vector<8x128xf32>
    tpu.vector_store %arg8[%c0_18, %c0_19], %24 {strides = array<i32>} : memref<8x128xf32, #tpu.memory_space<vmem>>, vector<8x128xf32>,
    return
  }
  func.func @transform_0(%arg0: i32) -> (i32, i32) {
    %c0_i32 = arith.constant 0 : i32
    %c0_i32_0 = arith.constant 0 : i32
    return %arg0, %c0_i32 : i32, i32
  }
  func.func @transform_1(%arg0: i32) -> (i32, i32) {
    %c0_i32 = arith.constant 0 : i32
    %c0_i32_0 = arith.constant 0 : i32
    return %arg0, %c0_i32 : i32, i32
  }
  func.func @transform_2(%arg0: i32) -> (i32, i32) {
    %c0_i32 = arith.constant 0 : i32
    %c0_i32_0 = arith.constant 0 : i32
    return %arg0, %c0_i32 : i32, i32
  }
  func.func @transform_3(%arg0: i32) -> (i32, i32) {
    %c0_i32 = arith.constant 0 : i32
    %c0_i32_0 = arith.constant 0 : i32
    %c0_i32_1 = arith.constant 0 : i32
    return %c0_i32, %c0_i32_0 : i32, i32
  }
  func.func @transform_4(%arg0: i32) -> (i32, i32) {
    %c0_i32 = arith.constant 0 : i32
    %c0_i32_0 = arith.constant 0 : i32
    %c0_i32_1 = arith.constant 0 : i32
    return %c0_i32, %c0_i32_0 : i32, i32
  }
  func.func @transform_5(%arg0: i32) -> (i32, i32) {
    %c0_i32 = arith.constant 0 : i32
    %c0_i32_0 = arith.constant 0 : i32
    %c0_i32_1 = arith.constant 0 : i32
    return %c0_i32, %c0_i32_0 : i32, i32
  }
  func.func @transform_6(%arg0: i32) -> (i32, i32) {
    %c0_i32 = arith.constant 0 : i32
    %c0_i32_0 = arith.constant 0 : i32
    %c0_i32_1 = arith.constant 0 : i32
    return %c0_i32, %c0_i32_0 : i32, i32
  }
  func.func @transform_7(%arg0: i32) -> (i32, i32) {
    %c0_i32 = arith.constant 0 : i32
    %c0_i32_0 = arith.constant 0 : i32
    return %arg0, %c0_i32 : i32, i32
  }
}

</mosaic_0001>

<bundles_post_ra>
// kernel: tpu_custom_call.1
= control target key start
LH: loop header
LB: loop body
LE: loop exit
PB: predicated region body
PF: predicated region fallthrough
CT: control target
= control target key end

     0   :  { %10 = vsyncpa [#allocation3], 0  ;;  %s401_s0 = inlined_call_operand.hbm [shape: f32[8,32], index: 0, kind: input, shape index: {}]   ;;  %s402_s1 = inlined_call_operand.hbm [shape: f32[8,32], index: 1, kind: input, shape index: {}]   ;;  %s403_s2 = inlined_call_operand.hbm [shape: f32[8,32], index: 2, kind: input, shape index: {}]   ;;  %s404_s3 = inlined_call_operand.hbm [shape: f32[96,256], index: 3, kind: input, shape index: {}]   ;;  %s405_s4 = inlined_call_operand.vmem [shape: f32[1,256], index: 4, kind: input, shape index: {}]   ;;  %s406_s5 = inlined_call_operand.hbm [shape: f32[8,128], index: 5, kind: output, shape index: {}]  }
   0x1   :  { %11 = vsyncpa [#allocation6], 0 }
   0x2   :  { %12 = vsyncpa [#allocation9], 0 }
   0x3   :  { %13 = vsyncpa [#allocation4], 0  ;;  %s343_s18 = smov [#allocation5]   ;;  %s344_s20 = smov [#allocation2]  }
   0x4   :  { %s30_s19 = sshll.u32 %s343_s18, 4  ;;  %s20_s21 = sshll.u32 %s344_s20, 4  ;;  %s31_s19 = int_to_ptr.vmem [resolvable:$true] %s30_s19  ;;  %s21_s21 = int_to_ptr.vmem [resolvable:$true] %s20_s21 }
   0x5   :  { %s243_s22 = scalar_lea.vmem %s31_s19, 128  ;;  %p248_p1 = scmp.lt.s32.totalorder %s31_s19, %s31_s19 }
   0x6   :  { %p244_p0 = scmp.ne.s32.totalorder %s31_s19, %s243_s22  ;;  %p249_p2 = scmp.lt.s32.totalorder %s243_s22, %s243_s22 }
   0x8   :  { %p250_p3 = por %p249_p2, %p248_p1 }
   0xa   :  { %p251_p4 = pnand %p250_p3, %p244_p0 }
   0xc   :  { %254 = shalt.err (!%p251_p4)
}
   0xd   :  { %33 = dma.hbm_to_vmem [thread:$0]  %s402_s1, 128, %s31_s19, [#allocation6]  }
   0xe   :  { %s263_s25 = scalar_lea.vmem %s21_s21, 128  ;;  %p268_p6 = scmp.lt.s32.totalorder %s21_s21, %s21_s21 }
   0xf   :  { %p264_p5 = scmp.ne.s32.totalorder %s21_s21, %s263_s25  ;;  %p269_p7 = scmp.lt.s32.totalorder %s263_s25, %s263_s25 }
  0x11   :  { %p270_p8 = por %p269_p7, %p268_p6 }
  0x13   :  { %p271_p9 = pnand %p270_p8, %p264_p5 }
  0x15   :  { %274 = shalt.err (!%p271_p9)
}
  0x16   :  { %23 = dma.hbm_to_vmem [thread:$0]  %s401_s0, 128, %s21_s21, [#allocation3]  }
  0x17   :  { %s345_s28 = smov [#allocation7]   ;;  %s346_s30 = smov [#allocation8]  }
  0x18   :  { %s40_s29 = sshll.u32 %s345_s28, 4  ;;  %s49_s6 = sshll.u32 %s346_s30, 4  ;;  %s41_s29 = int_to_ptr.vmem [resolvable:$true] %s40_s29  ;;  %s50_s6 = int_to_ptr.vmem [resolvable:$true] %s49_s6 }
  0x19   :  { %s283_s7 = scalar_lea.vmem %s41_s29, 128  ;;  %p288_p11 = scmp.lt.s32.totalorder %s41_s29, %s41_s29 }
  0x1a   :  { %p284_p10 = scmp.ne.s32.totalorder %s41_s29, %s283_s7  ;;  %p289_p12 = scmp.lt.s32.totalorder %s283_s7, %s283_s7 }
  0x1c   :  { %p290_p13 = por %p289_p12, %p288_p11 }
  0x1e   :  { %p291_p0 = pnand %p290_p13, %p284_p10 }
  0x20   :  { %294 = shalt.err (!%p291_p0)
}
  0x21   :  { %43 = dma.hbm_to_vmem [thread:$0]  %s403_s2, 128, %s41_s29, [#allocation6]  }
  0x22   :  { %s303_s9 = scalar_lea.vmem %s50_s6, 3072  ;;  %p308_p2 = scmp.lt.s32.totalorder %s50_s6, %s50_s6 }
  0x23   :  { %p304_p1 = scmp.ne.s32.totalorder %s50_s6, %s303_s9  ;;  %p309_p3 = scmp.lt.s32.totalorder %s303_s9, %s303_s9 }
  0x25   :  { %p310_p4 = por %p309_p3, %p308_p2 }
  0x27   :  { %p311_p5 = pnand %p310_p4, %p304_p1 }
  0x29   :  { %314 = shalt.err (!%p311_p5)
}
  0x2a   :  { %s347_s0 = smov 256   ;;  %s348_s10 = smov 16  }
  0x2b   :  { %55 = dma.hbm_to_vmem [thread:$0]  %s404_s3, 3072, %s50_s6, [#allocation9], %s347_s0, %s347_s0, %s348_s10  }
  0x2c   :  { %335 = dma.done.wait [#allocation3], 128  }
  0x2d   :  { %336 = vsyncadd [#allocation3], 4294967168 }
  0x2e   :  { %337 = dma.done.wait [#allocation6], 256  }
  0x2f   :  { %338 = vsyncadd [#allocation6], 4294967040 }
  0x30   :  { %339 = dma.done.wait [#allocation9], 3072  }
  0x31   :  { %340 = vsyncadd [#allocation9], 4294964224  ;;  %v349_v0 = vmov 0.0   ;;  %v71_v1 = vld [vmem:[#allocation5] sm:$0xff]  ;;  %v108_v2 = vld [vmem:[#allocation8 + $0xb8] sm:$0xff]  ;;  %s350_s2 = smov 32   ;;  %v111_v32 = vlaneseq }
  0x32   :  { %189 = vmatprep.mubr.f32.mxu0 %v349_v0  ;;  %74 = vrot.lane.b32.xlu0 %v71_v1, %s350_s2  ;;  %v107_v3 = vld [vmem:[#allocation8 + $0xb0] sm:$0xff]  ;;  %v106_v4 = vld [vmem:[#allocation8 + $0xa8] sm:$0xff]  ;;  %v105_v5 = vld [vmem:[#allocation8 + $0xa0] sm:$0xff]  ;;  %s351_s3 = smov 64   ;;  %vm81_vm0 = vcmask 261120   ;;  %vm83_vm1 = vcmask 523264  }
  0x33   :  { %133 = vmatprep.subr.mxu0 %v108_v2  ;;  %v72_v6 = vld [vmem:[#allocation7] sm:$0xff]  ;;  %v103_v8 = vld [vmem:[#allocation8 + $0x90] sm:$0xff]  ;;  %v102_v9 = vld [vmem:[#allocation8 + $0x88] sm:$0xff]  ;;  %vm121_vm2 = vcmask 785408   ;;  %v112_v33 = vshrl.u32 %v111_v32, 7  ;;  %s352_s15 = smov [#allocation10]  }
  0x34   :  { %134 = vmatpush1.msra.mxu0 %v107_v3  ;;  %v104_v7 = vld [vmem:[#allocation8 + $0x98] sm:$0xff]  ;;  %v101_v10 = vld [vmem:[#allocation8 + $0x80] sm:$0xff]  ;;  %v99_v12 = vld [vmem:[#allocation8 + $0x70] sm:$0xff]  ;;  %s209_s16 = sshll.u32 %s352_s15, 4  ;;  %s210_s16 = int_to_ptr.vmem [resolvable:$true] %s209_s16 }
  0x35   :  { %135 = vmatprep.subr.mxu0 %v106_v4  ;;  %v100_v11 = vld [vmem:[#allocation8 + $0x78] sm:$0xff]  ;;  %v98_v13 = vld [vmem:[#allocation8 + $0x68] sm:$0xff]  ;;  %v97_v14 = vld [vmem:[#allocation8 + $0x60] sm:$0xff]  ;;  %v117_v34 = vsub.s32 1, %v112_v33  ;;  %v113_v36 = vsub.s32 0, %v112_v33  ;;  %p320_p7 = scmp.lt.s32.totalorder %s210_s16, %s210_s16 }
  0x36   :  { %136 = vmatpush1.msra.mxu0 %v105_v5  ;;  %78 = vrot.lane.b32.xlu0 %v72_v6, %s351_s3  ;;  %v96_v15 = vld [vmem:[#allocation8 + $0x58] sm:$0xff]  ;;  %v95_v16 = vld [vmem:[#allocation8 + $0x50] sm:$0xff]  ;;  %v94_v17 = vld [vmem:[#allocation8 + $0x48] sm:$0xff] }
  0x37   :  { %137 = vmatprep.subr.mxu0 %v104_v7  ;;  %v93_v18 = vld [vmem:[#allocation8 + $0x40] sm:$0xff]  ;;  %v92_v19 = vld [vmem:[#allocation8 + $0x38] sm:$0xff]  ;;  %v91_v20 = vld [vmem:[#allocation8 + $0x30] sm:$0xff] }
  0x38   :  { %138 = vmatpush1.msra.mxu0 %v103_v8  ;;  %v90_v21 = vld [vmem:[#allocation8 + $0x28] sm:$0xff]  ;;  %v89_v22 = vld [vmem:[#allocation8 + $0x20] sm:$0xff]  ;;  %v88_v23 = vld [vmem:[#allocation8 + $0x18] sm:$0xff] }
  0x39   :  { %139 = vmatprep.subr.mxu0 %v102_v9  ;;  %v87_v24 = vld [vmem:[#allocation8 + $0x10] sm:$0xff]  ;;  %v86_v25 = vld [vmem:[#allocation8 + $0x8] sm:$0xff]  ;;  %v85_v26 = vld [vmem:[#allocation8] sm:$0xff] }
  0x3a   :  { %140 = vmatpush1.msra.mxu0 %v101_v10  ;;  %v70_v28 = vld [vmem:[#allocation2] sm:$0xff] }
  0x3b   :  { %141 = vmatprep.subr.mxu0 %v100_v11  ;;  %v109_v35 = vld [vmem:[%s405_s4] sm:$0x3]  ;;  %s315_s4 = scalar_lea.vmem %s210_s16, 128 }
  0x3c   :  { %142 = vmatpush1.msra.mxu0 %v99_v12  ;;  %v118_v37 = vrot.slane %v109_v35, %v117_v34  ;;  %v114_v40 = vrot.slane %v109_v35, %v113_v36  ;;  %p316_p6 = scmp.ne.s32.totalorder %s210_s16, %s315_s4  ;;  %p321_p8 = scmp.lt.s32.totalorder %s315_s4, %s315_s4 }
  0x3d   :  { %143 = vmatprep.subr.mxu0 %v98_v13 }
  0x3e   :  { %144 = vmatpush1.msra.mxu0 %v97_v14  ;;  %p322_p9 = por %p321_p8, %p320_p7 }
  0x3f   :  { %145 = vmatprep.subr.mxu0 %v96_v15 }
  0x40   :  { %146 = vmatpush1.msra.mxu0 %v95_v16  ;;  %p323_p10 = pnand %p322_p9, %p316_p6 }
  0x41   :  { %147 = vmatprep.subr.mxu0 %v94_v17 }
  0x42   :  { %148 = vmatpush1.msra.mxu0 %v93_v18 }
  0x43   :  { %149 = vmatprep.subr.mxu0 %v92_v19 }
  0x44   :  { %150 = vmatpush1.msra.mxu0 %v91_v20 }
  0x45   :  { %151 = vmatprep.subr.mxu0 %v90_v21 }
  0x46   :  { %152 = vmatpush1.msra.mxu0 %v89_v22 }
  0x47   :  { %153 = vmatprep.subr.mxu0 %v88_v23 }
  0x48   :  { %154 = vmatpush1.msra.mxu0 %v87_v24 }
  0x49   :  { %155 = vmatprep.subr.mxu0 %v86_v25 }
  0x4a   :  { %156 = vmatpush1.msra.mxu0 %v85_v26 }
  0xa4   :  { %v75_v27 = vpop.permute.xlu0 %74 }
  0xa5   :  { %v82_v29 = vsel %vm81_vm0, %v70_v28, %v75_v27 }
  0xa8   :  { %v79_v30 = vpop.permute.xlu0 %78 }
  0xa9   :  { %v84_v31 = vsel %vm83_vm1, %v82_v29, %v79_v30 }
  0xaa   :  { %220 = vmatmul.mubr.msk.f32.vlgmr.msra.gmra.mxu0 %vm121_vm2, %v84_v31 }
 0x16a   :  { %v191_v38 = vpop.f32.mrf.mxu0 }
 0x16b   :  { %v192_v43 = vadd.f32 %v191_v38, %v114_v40 }
 0x16c   :  { %v193_v39 = vpop.f32.mrf.mxu0 }
 0x16d   :  { %v194_v41 = vadd.f32 %v193_v39, %v118_v37 }
 0x16f   :  { %v197_v42 = vmul.f32 0.5, %v194_v41 }
 0x171   :  { %231 = vtanh.f32 %v197_v42 }
 0x172   :  { %233 = vtanh.f32 %v192_v43 }
 0x17e   :  { %v232_v44 = vpop.eup %231 }
 0x17f   :  { %v199_v45 = vmul.f32 0.5, %v232_v44  ;;  %v234_v47 = vpop.eup %233 }
 0x181   :  { %v200_v46 = vadd.f32 0.5, %v199_v45 }
 0x183   :  { %v201_v48 = vmul.f32 %v234_v47, %v200_v46 }
 0x185   :  { %202 = vst [vmem:[#allocation10] sm:$0xff] %v201_v48 }
 0x186   :  { %326 = shalt.err (!%p323_p10)
}
 0x187   :  { %212 = dma.vmem_to_hbm [thread:$0]  %s210_s16, 128, %s406_s5, [#allocation4]  }
 0x188   :  { %341 = dma.done.wait [#allocation4], 128  }
 0x189   :  { %342 = vsyncadd [#allocation4], 4294967168 }
 0x18a   :  { %216 = vsyncpa [#allocation3], 1 }
 0x18b   :  { %217 = vsyncpa [#allocation6], 1 }
 0x18c   :  { %218 = vsyncpa [#allocation9], 1 }
 0x18d   :  { %219 = vsyncpa [#allocation4], 1 }

// kernel: tpu_custom_call.1
= control target key start
LH: loop header
LB: loop body
LE: loop exit
PB: predicated region body
PF: predicated region fallthrough
CT: control target
= control target key end

     0   :  { %10 = vsyncpa [#allocation3], 0  ;;  %s401_s0 = inlined_call_operand.hbm [shape: f32[8,32], index: 0, kind: input, shape index: {}]   ;;  %s402_s1 = inlined_call_operand.hbm [shape: f32[8,32], index: 1, kind: input, shape index: {}]   ;;  %s403_s2 = inlined_call_operand.hbm [shape: f32[8,32], index: 2, kind: input, shape index: {}]   ;;  %s404_s3 = inlined_call_operand.hbm [shape: f32[96,256], index: 3, kind: input, shape index: {}]   ;;  %s405_s4 = inlined_call_operand.vmem [shape: f32[1,256], index: 4, kind: input, shape index: {}]   ;;  %s406_s5 = inlined_call_operand.hbm [shape: f32[8,128], index: 5, kind: output, shape index: {}]  }
   0x1   :  { %11 = vsyncpa [#allocation6], 0 }
   0x2   :  { %12 = vsyncpa [#allocation9], 0 }
   0x3   :  { %13 = vsyncpa [#allocation4], 0  ;;  %s343_s18 = smov [#allocation5]   ;;  %s344_s20 = smov [#allocation2]  }
   0x4   :  { %s30_s19 = sshll.u32 %s343_s18, 4  ;;  %s20_s21 = sshll.u32 %s344_s20, 4  ;;  %s31_s19 = int_to_ptr.vmem [resolvable:$true] %s30_s19  ;;  %s21_s21 = int_to_ptr.vmem [resolvable:$true] %s20_s21 }
   0x5   :  { %s243_s22 = scalar_lea.vmem %s31_s19, 128  ;;  %p248_p1 = scmp.lt.s32.totalorder %s31_s19, %s31_s19 }
   0x6   :  { %p244_p0 = scmp.ne.s32.totalorder %s31_s19, %s243_s22  ;;  %p249_p2 = scmp.lt.s32.totalorder %s243_s22, %s243_s22 }
   0x8   :  { %p250_p3 = por %p249_p2, %p248_p1 }
   0xa   :  { %p251_p4 = pnand %p250_p3, %p244_p0 }
   0xc   :  { %254 = shalt.err (!%p251_p4)
}
   0xd   :  { %33 = dma.hbm_to_vmem [thread:$0]  %s402_s1, 128, %s31_s19, [#allocation6]  }
   0xe   :  { %s263_s25 = scalar_lea.vmem %s21_s21, 128  ;;  %p268_p6 = scmp.lt.s32.totalorder %s21_s21, %s21_s21 }
   0xf   :  { %p264_p5 = scmp.ne.s32.totalorder %s21_s21, %s263_s25  ;;  %p269_p7 = scmp.lt.s32.totalorder %s263_s25, %s263_s25 }
  0x11   :  { %p270_p8 = por %p269_p7, %p268_p6 }
  0x13   :  { %p271_p9 = pnand %p270_p8, %p264_p5 }
  0x15   :  { %274 = shalt.err (!%p271_p9)
}
  0x16   :  { %23 = dma.hbm_to_vmem [thread:$0]  %s401_s0, 128, %s21_s21, [#allocation3]  }
  0x17   :  { %s345_s28 = smov [#allocation7]   ;;  %s346_s30 = smov [#allocation8]  }
  0x18   :  { %s40_s29 = sshll.u32 %s345_s28, 4  ;;  %s49_s6 = sshll.u32 %s346_s30, 4  ;;  %s41_s29 = int_to_ptr.vmem [resolvable:$true] %s40_s29  ;;  %s50_s6 = int_to_ptr.vmem [resolvable:$true] %s49_s6 }
  0x19   :  { %s283_s7 = scalar_lea.vmem %s41_s29, 128  ;;  %p288_p11 = scmp.lt.s32.totalorder %s41_s29, %s41_s29 }
  0x1a   :  { %p284_p10 = scmp.ne.s32.totalorder %s41_s29, %s283_s7  ;;  %p289_p12 = scmp.lt.s32.totalorder %s283_s7, %s283_s7 }
  0x1c   :  { %p290_p13 = por %p289_p12, %p288_p11 }
  0x1e   :  { %p291_p0 = pnand %p290_p13, %p284_p10 }
  0x20   :  { %294 = shalt.err (!%p291_p0)
}
  0x21   :  { %43 = dma.hbm_to_vmem [thread:$0]  %s403_s2, 128, %s41_s29, [#allocation6]  }
  0x22   :  { %s303_s9 = scalar_lea.vmem %s50_s6, 3072  ;;  %p308_p2 = scmp.lt.s32.totalorder %s50_s6, %s50_s6 }
  0x23   :  { %p304_p1 = scmp.ne.s32.totalorder %s50_s6, %s303_s9  ;;  %p309_p3 = scmp.lt.s32.totalorder %s303_s9, %s303_s9 }
  0x25   :  { %p310_p4 = por %p309_p3, %p308_p2 }
  0x27   :  { %p311_p5 = pnand %p310_p4, %p304_p1 }
  0x29   :  { %314 = shalt.err (!%p311_p5)
}
  0x2a   :  { %s347_s0 = smov 256   ;;  %s348_s10 = smov 16  }
  0x2b   :  { %55 = dma.hbm_to_vmem [thread:$0]  %s404_s3, 3072, %s50_s6, [#allocation9], %s347_s0, %s347_s0, %s348_s10  }
  0x2c   :  { %335 = dma.done.wait [#allocation3], 128  }
  0x2d   :  { %336 = vsyncadd [#allocation3], 4294967168 }
  0x2e   :  { %337 = dma.done.wait [#allocation6], 256  }
  0x2f   :  { %338 = vsyncadd [#allocation6], 4294967040 }
  0x30   :  { %339 = dma.done.wait [#allocation9], 3072  }
  0x31   :  { %340 = vsyncadd [#allocation9], 4294964224  ;;  %v349_v0 = vmov 0.0   ;;  %v71_v1 = vld [vmem:[#allocation5] sm:$0xff]  ;;  %v108_v2 = vld [vmem:[#allocation8 + $0xb8] sm:$0xff]  ;;  %s350_s2 = smov 32   ;;  %v111_v32 = vlaneseq }
  0x32   :  { %189 = vmatprep.mubr.f32.mxu0 %v349_v0  ;;  %74 = vrot.lane.b32.xlu0 %v71_v1, %s350_s2  ;;  %v107_v3 = vld [vmem:[#allocation8 + $0xb0] sm:$0xff]  ;;  %v106_v4 = vld [vmem:[#allocation8 + $0xa8] sm:$0xff]  ;;  %v105_v5 = vld [vmem:[#allocation8 + $0xa0] sm:$0xff]  ;;  %s351_s3 = smov 64   ;;  %vm81_vm0 = vcmask 261120   ;;  %vm83_vm1 = vcmask 523264  }
  0x33   :  { %133 = vmatprep.subr.mxu0 %v108_v2  ;;  %v72_v6 = vld [vmem:[#allocation7] sm:$0xff]  ;;  %v103_v8 = vld [vmem:[#allocation8 + $0x90] sm:$0xff]  ;;  %v102_v9 = vld [vmem:[#allocation8 + $0x88] sm:$0xff]  ;;  %vm121_vm2 = vcmask 785408   ;;  %v112_v33 = vshrl.u32 %v111_v32, 7  ;;  %s352_s15 = smov [#allocation10]  }
  0x34   :  { %134 = vmatpush1.msra.mxu0 %v107_v3  ;;  %v104_v7 = vld [vmem:[#allocation8 + $0x98] sm:$0xff]  ;;  %v101_v10 = vld [vmem:[#allocation8 + $0x80] sm:$0xff]  ;;  %v99_v12 = vld [vmem:[#allocation8 + $0x70] sm:$0xff]  ;;  %s209_s16 = sshll.u32 %s352_s15, 4  ;;  %s210_s16 = int_to_ptr.vmem [resolvable:$true] %s209_s16 }
  0x35   :  { %135 = vmatprep.subr.mxu0 %v106_v4  ;;  %v100_v11 = vld [vmem:[#allocation8 + $0x78] sm:$0xff]  ;;  %v98_v13 = vld [vmem:[#allocation8 + $0x68] sm:$0xff]  ;;  %v97_v14 = vld [vmem:[#allocation8 + $0x60] sm:$0xff]  ;;  %v117_v34 = vsub.s32 1, %v112_v33  ;;  %v113_v36 = vsub.s32 0, %v112_v33  ;;  %p320_p7 = scmp.lt.s32.totalorder %s210_s16, %s210_s16 }
  0x36   :  { %136 = vmatpush1.msra.mxu0 %v105_v5  ;;  %78 = vrot.lane.b32.xlu0 %v72_v6, %s351_s3  ;;  %v96_v15 = vld [vmem:[#allocation8 + $0x58] sm:$0xff]  ;;  %v95_v16 = vld [vmem:[#allocation8 + $0x50] sm:$0xff]  ;;  %v94_v17 = vld [vmem:[#allocation8 + $0x48] sm:$0xff] }
  0x37   :  { %137 = vmatprep.subr.mxu0 %v104_v7  ;;  %v93_v18 = vld [vmem:[#allocation8 + $0x40] sm:$0xff]  ;;  %v92_v19 = vld [vmem:[#allocation8 + $0x38] sm:$0xff]  ;;  %v91_v20 = vld [vmem:[#allocation8 + $0x30] sm:$0xff] }
  0x38   :  { %138 = vmatpush1.msra.mxu0 %v103_v8  ;;  %v90_v21 = vld [vmem:[#allocation8 + $0x28] sm:$0xff]  ;;  %v89_v22 = vld [vmem:[#allocation8 + $0x20] sm:$0xff]  ;;  %v88_v23 = vld [vmem:[#allocation8 + $0x18] sm:$0xff] }
  0x39   :  { %139 = vmatprep.subr.mxu0 %v102_v9  ;;  %v87_v24 = vld [vmem:[#allocation8 + $0x10] sm:$0xff]  ;;  %v86_v25 = vld [vmem:[#allocation8 + $0x8] sm:$0xff]  ;;  %v85_v26 = vld [vmem:[#allocation8] sm:$0xff] }
  0x3a   :  { %140 = vmatpush1.msra.mxu0 %v101_v10  ;;  %v70_v28 = vld [vmem:[#allocation2] sm:$0xff] }
  0x3b   :  { %141 = vmatprep.subr.mxu0 %v100_v11  ;;  %v109_v35 = vld [vmem:[%s405_s4] sm:$0x3]  ;;  %s315_s4 = scalar_lea.vmem %s210_s16, 128 }
  0x3c   :  { %142 = vmatpush1.msra.mxu0 %v99_v12  ;;  %v118_v37 = vrot.slane %v109_v35, %v117_v34  ;;  %v114_v40 = vrot.slane %v109_v35, %v113_v36  ;;  %p316_p6 = scmp.ne.s32.totalorder %s210_s16, %s315_s4  ;;  %p321_p8 = scmp.lt.s32.totalorder %s315_s4, %s315_s4 }
  0x3d   :  { %143 = vmatprep.subr.mxu0 %v98_v13 }
  0x3e   :  { %144 = vmatpush1.msra.mxu0 %v97_v14  ;;  %p322_p9 = por %p321_p8, %p320_p7 }
  0x3f   :  { %145 = vmatprep.subr.mxu0 %v96_v15 }
  0x40   :  { %146 = vmatpush1.msra.mxu0 %v95_v16  ;;  %p323_p10 = pnand %p322_p9, %p316_p6 }
  0x41   :  { %147 = vmatprep.subr.mxu0 %v94_v17 }
  0x42   :  { %148 = vmatpush1.msra.mxu0 %v93_v18 }
  0x43   :  { %149 = vmatprep.subr.mxu0 %v92_v19 }
  0x44   :  { %150 = vmatpush1.msra.mxu0 %v91_v20 }
  0x45   :  { %151 = vmatprep.subr.mxu0 %v90_v21 }
  0x46   :  { %152 = vmatpush1.msra.mxu0 %v89_v22 }
  0x47   :  { %153 = vmatprep.subr.mxu0 %v88_v23 }
  0x48   :  { %154 = vmatpush1.msra.mxu0 %v87_v24 }
  0x49   :  { %155 = vmatprep.subr.mxu0 %v86_v25 }
  0x4a   :  { %156 = vmatpush1.msra.mxu0 %v85_v26 }
  0xa4   :  { %v75_v27 = vpop.permute.xlu0 %74 }
  0xa5   :  { %v82_v29 = vsel %vm81_vm0, %v70_v28, %v75_v27 }
  0xa8   :  { %v79_v30 = vpop.permute.xlu0 %78 }
  0xa9   :  { %v84_v31 = vsel %vm83_vm1, %v82_v29, %v79_v30 }
  0xaa   :  { %220 = vmatmul.mubr.msk.f32.vlgmr.msra.gmra.mxu0 %vm121_vm2, %v84_v31 }
 0x16a   :  { %v191_v38 = vpop.f32.mrf.mxu0 }
 0x16b   :  { %v192_v43 = vadd.f32 %v191_v38, %v114_v40 }
 0x16c   :  { %v193_v39 = vpop.f32.mrf.mxu0 }
 0x16d   :  { %v194_v41 = vadd.f32 %v193_v39, %v118_v37 }
 0x16f   :  { %v197_v42 = vmul.f32 0.5, %v194_v41 }
 0x171   :  { %231 = vtanh.f32 %v197_v42 }
 0x172   :  { %233 = vtanh.f32 %v192_v43 }
 0x17e   :  { %v232_v44 = vpop.eup %231 }
 0x17f   :  { %v199_v45 = vmul.f32 0.5, %v232_v44  ;;  %v234_v47 = vpop.eup %233 }
 0x181   :  { %v200_v46 = vadd.f32 0.5, %v199_v45 }
 0x183   :  { %v201_v48 = vmul.f32 %v234_v47, %v200_v46 }
 0x185   :  { %202 = vst [vmem:[#allocation10] sm:$0xff] %v201_v48 }
 0x186   :  { %326 = shalt.err (!%p323_p10)
}
 0x187   :  { %212 = dma.vmem_to_hbm [thread:$0]  %s210_s16, 128, %s406_s5, [#allocation4]  }
 0x188   :  { %341 = dma.done.wait [#allocation4], 128  }
 0x189   :  { %342 = vsyncadd [#allocation4], 4294967168 }
 0x18a   :  { %216 = vsyncpa [#allocation3], 1 }
 0x18b   :  { %217 = vsyncpa [#allocation6], 1 }
 0x18c   :  { %218 = vsyncpa [#allocation9], 1 }
 0x18d   :  { %219 = vsyncpa [#allocation4], 1 }

// kernel: tpu_custom_call.1
= control target key start
LH: loop header
LB: loop body
LE: loop exit
PB: predicated region body
PF: predicated region fallthrough
CT: control target
= control target key end

     0   :  { %12 = vsyncpa [#allocation3], 0  ;;  %s647_s0 = inlined_call_operand.hbm [shape: f32[8,32], index: 0, kind: input, shape index: {}]   ;;  %s648_s1 = inlined_call_operand.hbm [shape: f32[8,32], index: 1, kind: input, shape index: {}]   ;;  %s649_s2 = inlined_call_operand.hbm [shape: f32[8,32], index: 2, kind: input, shape index: {}]   ;;  %s650_s3 = inlined_call_operand.hbm [shape: f32[32,256], index: 3, kind: input, shape index: {}]   ;;  %s651_s4 = inlined_call_operand.hbm [shape: f32[32,256], index: 4, kind: input, shape index: {}]   ;;  %s652_s5 = inlined_call_operand.hbm [shape: f32[32,256], index: 5, kind: input, shape index: {}]   ;;  %s653_s6 = inlined_call_operand.vmem [shape: f32[1,256], index: 6, kind: input, shape index: {}]   ;;  %s654_s7 = inlined_call_operand.hbm [shape: f32[8,128], index: 7, kind: output, shape index: {}]  }
   0x1   :  { %13 = vsyncpa [#allocation6], 0 }
   0x2   :  { %14 = vsyncpa [#allocation9], 0 }
   0x3   :  { %15 = vsyncpa [#allocation12], 0 }
   0x4   :  { %16 = vsyncpa [#allocation4], 0  ;;  %s561_s24 = smov [#allocation5]   ;;  %s562_s26 = smov [#allocation8]  }
   0x5   :  { %s33_s25 = sshll.u32 %s561_s24, 4  ;;  %s52_s27 = sshll.u32 %s562_s26, 4  ;;  %s34_s25 = int_to_ptr.vmem [resolvable:$true] %s33_s25  ;;  %s53_s27 = int_to_ptr.vmem [resolvable:$true] %s52_s27 }
   0x6   :  { %s419_s28 = scalar_lea.vmem %s34_s25, 128  ;;  %p424_p1 = scmp.lt.s32.totalorder %s34_s25, %s34_s25 }
   0x7   :  { %p420_p0 = scmp.ne.s32.totalorder %s34_s25, %s419_s28  ;;  %p425_p2 = scmp.lt.s32.totalorder %s419_s28, %s419_s28 }
   0x9   :  { %p426_p3 = por %p425_p2, %p424_p1 }
   0xb   :  { %p427_p4 = pnand %p426_p3, %p420_p0 }
   0xd   :  { %430 = shalt.err (!%p427_p4)
}
   0xe   :  { %36 = dma.hbm_to_vmem [thread:$0]  %s648_s1, 128, %s34_s25, [#allocation6]  }
   0xf   :  { %s439_s8 = scalar_lea.vmem %s53_s27, 1024  ;;  %p444_p6 = scmp.lt.s32.totalorder %s53_s27, %s53_s27 }
  0x10   :  { %p440_p5 = scmp.ne.s32.totalorder %s53_s27, %s439_s8  ;;  %p445_p7 = scmp.lt.s32.totalorder %s439_s8, %s439_s8 }
  0x12   :  { %p446_p8 = por %p445_p7, %p444_p6 }
  0x14   :  { %p447_p9 = pnand %p446_p8, %p440_p5 }
  0x16   :  { %450 = shalt.err (!%p447_p9)
}
  0x17   :  { %s563_s9 = smov 256   ;;  %s564_s10 = smov 16  }
  0x18   :  { %58 = dma.hbm_to_vmem [thread:$0]  %s650_s3, 1024, %s53_s27, [#allocation9], %s563_s9, %s563_s9, %s564_s10  }
  0x19   :  { %s565_s13 = smov [#allocation2]   ;;  %s566_s15 = smov [#allocation7]  }
  0x1a   :  { %s23_s14 = sshll.u32 %s565_s13, 4  ;;  %s43_s1 = sshll.u32 %s566_s15, 4  ;;  %s24_s14 = int_to_ptr.vmem [resolvable:$true] %s23_s14  ;;  %s44_s1 = int_to_ptr.vmem [resolvable:$true] %s43_s1 }
  0x1b   :  { %s459_s16 = scalar_lea.vmem %s24_s14, 128  ;;  %p464_p11 = scmp.lt.s32.totalorder %s24_s14, %s24_s14 }
  0x1c   :  { %p460_p10 = scmp.ne.s32.totalorder %s24_s14, %s459_s16  ;;  %p465_p12 = scmp.lt.s32.totalorder %s459_s16, %s459_s16 }
  0x1e   :  { %p466_p13 = por %p465_p12, %p464_p11 }
  0x20   :  { %p467_p0 = pnand %p466_p13, %p460_p10 }
  0x22   :  { %470 = shalt.err (!%p467_p0)
}
  0x23   :  { %26 = dma.hbm_to_vmem [thread:$0]  %s647_s0, 128, %s24_s14, [#allocation3]  }
  0x24   :  { %s479_s19 = scalar_lea.vmem %s44_s1, 128  ;;  %p484_p2 = scmp.lt.s32.totalorder %s44_s1, %s44_s1 }
  0x25   :  { %p480_p1 = scmp.ne.s32.totalorder %s44_s1, %s479_s19  ;;  %p485_p3 = scmp.lt.s32.totalorder %s479_s19, %s479_s19 }
  0x27   :  { %p486_p4 = por %p485_p3, %p484_p2 }
  0x29   :  { %p487_p5 = pnand %p486_p4, %p480_p1 }
  0x2b   :  { %490 = shalt.err (!%p487_p5)
}
  0x2c   :  { %46 = dma.hbm_to_vmem [thread:$0]  %s649_s2, 128, %s44_s1, [#allocation6]  }
  0x2d   :  { %s567_s21 = smov [#allocation10]   ;;  %s568_s23 = smov [#allocation11]  }
  0x2e   :  { %s64_s22 = sshll.u32 %s567_s21, 4  ;;  %s76_s24 = sshll.u32 %s568_s23, 4  ;;  %s65_s22 = int_to_ptr.vmem [resolvable:$true] %s64_s22  ;;  %s77_s24 = int_to_ptr.vmem [resolvable:$true] %s76_s24 }
  0x2f   :  { %s499_s25 = scalar_lea.vmem %s65_s22, 1024  ;;  %p504_p7 = scmp.lt.s32.totalorder %s65_s22, %s65_s22 }
  0x30   :  { %p500_p6 = scmp.ne.s32.totalorder %s65_s22, %s499_s25  ;;  %p505_p8 = scmp.lt.s32.totalorder %s499_s25, %s499_s25 }
  0x32   :  { %p506_p9 = por %p505_p8, %p504_p7 }
  0x34   :  { %p507_p10 = pnand %p506_p9, %p500_p6 }
  0x36   :  { %510 = shalt.err (!%p507_p10)
}
  0x37   :  { %70 = dma.hbm_to_vmem [thread:$0]  %s651_s4, 1024, %s65_s22, [#allocation9], %s563_s9, %s563_s9, %s564_s10  }
  0x38   :  { %s519_s2 = scalar_lea.vmem %s77_s24, 1024  ;;  %p524_p12 = scmp.lt.s32.totalorder %s77_s24, %s77_s24 }
  0x39   :  { %p520_p11 = scmp.ne.s32.totalorder %s77_s24, %s519_s2  ;;  %p525_p13 = scmp.lt.s32.totalorder %s519_s2, %s519_s2 }
  0x3b   :  { %p526_p0 = por %p525_p13, %p524_p12 }
  0x3d   :  { %p527_p1 = pnand %p526_p0, %p520_p11 }
  0x3f   :  { %530 = shalt.err (!%p527_p1)
}
  0x40   :  { %82 = dma.hbm_to_vmem [thread:$0]  %s652_s5, 1024, %s77_s24, [#allocation12], %s563_s9, %s563_s9, %s564_s10  }
  0x41   :  { %551 = dma.done.wait [#allocation3], 128  }
  0x42   :  { %552 = vsyncadd [#allocation3], 4294967168 }
  0x43   :  { %553 = dma.done.wait [#allocation6], 256  }
  0x44   :  { %554 = vsyncadd [#allocation6], 4294967040 }
  0x45   :  { %555 = dma.done.wait [#allocation9], 2048  }
  0x46   :  { %556 = vsyncadd [#allocation9], 4294965248 }
  0x47   :  { %557 = dma.done.wait [#allocation12], 1024  }
  0x48   :  { %558 = vsyncadd [#allocation12], 4294966272  ;;  %v569_v0 = vmov 0.0   ;;  %v120_v1 = vld [vmem:[#allocation10 + $0x38] sm:$0xff]  ;;  %v119_v3 = vld [vmem:[#allocation10 + $0x30] sm:$0xff]  ;;  %vm121_vm0 = vcmask 261120   ;;  %v357_v28 = vlaneseq }
  0x49   :  { %189 = vmatprep.mubr.f32.mxu0 %v569_v0  ;;  %263 = vmatprep.mubr.f32.mxu1 %v569_v0  ;;  %v111_v2 = vld [vmem:[#allocation8 + $0x38] sm:$0xff]  ;;  %v110_v4 = vld [vmem:[#allocation8 + $0x30] sm:$0xff]  ;;  %v118_v5 = vld [vmem:[#allocation10 + $0x28] sm:$0xff]  ;;  %s570_s29 = smov [#allocation13]  }
  0x4a   :  { %149 = vmatprep.subr.mxu0 %v120_v1  ;;  %223 = vmatprep.subr.mxu1 %v111_v2  ;;  %v109_v6 = vld [vmem:[#allocation8 + $0x28] sm:$0xff]  ;;  %v117_v7 = vld [vmem:[#allocation10 + $0x20] sm:$0xff]  ;;  %v116_v9 = vld [vmem:[#allocation10 + $0x18] sm:$0xff]  ;;  %v358_v31 = vshrl.u32 %v357_v28, 7  ;;  %s382_s30 = sshll.u32 %s570_s29, 4  ;;  %s383_s30 = int_to_ptr.vmem [resolvable:$true] %s382_s30 }
  0x4b   :  { %150 = vmatpush1.msra.mxu0 %v119_v3  ;;  %224 = vmatpush1.msra.mxu1 %v110_v4  ;;  %v108_v8 = vld [vmem:[#allocation8 + $0x20] sm:$0xff]  ;;  %v107_v10 = vld [vmem:[#allocation8 + $0x18] sm:$0xff]  ;;  %v115_v11 = vld [vmem:[#allocation10 + $0x10] sm:$0xff]  ;;  %p536_p3 = scmp.lt.s32.totalorder %s383_s30, %s383_s30 }
  0x4c   :  { %151 = vmatprep.subr.mxu0 %v118_v5  ;;  %225 = vmatprep.subr.mxu1 %v109_v6  ;;  %v106_v12 = vld [vmem:[#allocation8 + $0x10] sm:$0xff]  ;;  %v114_v13 = vld [vmem:[#allocation10 + $0x8] sm:$0xff]  ;;  %v113_v15 = vld [vmem:[#allocation10] sm:$0xff]  ;;  %v363_v32 = vsub.s32 1, %v358_v31  ;;  %v359_v38 = vsub.s32 0, %v358_v31 }
  0x4d   :  { %152 = vmatpush1.msra.mxu0 %v117_v7  ;;  %226 = vmatpush1.msra.mxu1 %v108_v8  ;;  %v105_v14 = vld [vmem:[#allocation8 + $0x8] sm:$0xff]  ;;  %v104_v16 = vld [vmem:[#allocation8] sm:$0xff]  ;;  %v112_v17 = vld [vmem:[#allocation5] sm:$0xff] }
  0x4e   :  { %153 = vmatprep.subr.mxu0 %v116_v9  ;;  %227 = vmatprep.subr.mxu1 %v107_v10  ;;  %v103_v18 = vld [vmem:[#allocation2] sm:$0xff]  ;;  %v278_v19 = vld [vmem:[#allocation11 + $0x38] sm:$0xff]  ;;  %v277_v20 = vld [vmem:[#allocation11 + $0x30] sm:$0xff] }
  0x4f   :  { %154 = vmatpush1.msra.mxu0 %v115_v11  ;;  %228 = vmatpush1.msra.mxu1 %v106_v12  ;;  %v276_v21 = vld [vmem:[#allocation11 + $0x28] sm:$0xff]  ;;  %v275_v22 = vld [vmem:[#allocation11 + $0x20] sm:$0xff]  ;;  %v274_v23 = vld [vmem:[#allocation11 + $0x18] sm:$0xff] }
  0x50   :  { %155 = vmatprep.subr.mxu0 %v114_v13  ;;  %229 = vmatprep.subr.mxu1 %v105_v14  ;;  %v273_v24 = vld [vmem:[#allocation11 + $0x10] sm:$0xff]  ;;  %v272_v25 = vld [vmem:[#allocation11 + $0x8] sm:$0xff]  ;;  %v271_v26 = vld [vmem:[#allocation11] sm:$0xff] }
  0x51   :  { %156 = vmatpush1.msra.mxu0 %v113_v15  ;;  %230 = vmatpush1.msra.mxu1 %v104_v16  ;;  %v270_v27 = vld [vmem:[#allocation7] sm:$0xff]  ;;  %v355_v36 = vld [vmem:[%s653_s6] sm:$0x3]  ;;  %s531_s6 = scalar_lea.vmem %s383_s30, 128 }
  0x52   :  { %394 = vmatmul.mubr.msk.f32.vlgmr.msra.gmra.mxu0 %vm121_vm0, %v112_v17  ;;  %395 = vmatmul.mubr.msk.f32.vlgmr.msra.gmra.mxu1 %vm121_vm0, %v103_v18  ;;  %v364_v39 = vrot.slane %v355_v36, %v363_v32  ;;  %v360_v44 = vrot.slane %v355_v36, %v359_v38  ;;  %p532_p2 = scmp.ne.s32.totalorder %s383_s30, %s531_s6  ;;  %p537_p4 = scmp.lt.s32.totalorder %s531_s6, %s531_s6 }
  0x53   :  { %306 = vmatprep.subr.mxu0 %v278_v19  ;;  %346 = vmatprep.mubr.f32.mxu0 %v569_v0 }
  0x54   :  { %307 = vmatpush1.msra.mxu0 %v277_v20  ;;  %p538_p5 = por %p537_p4, %p536_p3 }
  0x55   :  { %308 = vmatprep.subr.mxu0 %v276_v21 }
  0x56   :  { %309 = vmatpush1.msra.mxu0 %v275_v22  ;;  %p539_p6 = pnand %p538_p5, %p532_p2 }
  0x57   :  { %310 = vmatprep.subr.mxu0 %v274_v23 }
  0x58   :  { %311 = vmatpush1.msra.mxu0 %v273_v24 }
  0x59   :  { %312 = vmatprep.subr.mxu0 %v272_v25 }
  0x5a   :  { %313 = vmatpush1.msra.mxu0 %v271_v26 }
  0x5b   :  { %396 = vmatmul.mubr.msk.f32.vlgmr.msra.gmra.mxu0 %vm121_vm0, %v270_v27 }
 0x112   :  { %v191_v29 = vpop.f32.mrf.mxu0  ;;  %v265_v30 = vpop.f32.mrf.mxu1 }
 0x113   :  { %v266_v41 = vadd.f32 %v265_v30, %v191_v29 }
 0x114   :  { %v193_v33 = vpop.f32.mrf.mxu0  ;;  %v267_v34 = vpop.f32.mrf.mxu1 }
 0x115   :  { %v268_v37 = vadd.f32 %v267_v34, %v193_v33 }
 0x11b   :  { %v348_v35 = vpop.f32.mrf.mxu0 }
 0x11c   :  { %v353_v43 = vadd.f32 %v348_v35, %v266_v41 }
 0x11d   :  { %v350_v40 = vpop.f32.mrf.mxu0 }
 0x11e   :  { %v354_v42 = vadd.f32 %v350_v40, %v268_v37  ;;  %v367_v47 = vadd.f32 %v360_v44, %v353_v43 }
 0x120   :  { %v368_v45 = vadd.f32 %v364_v39, %v354_v42 }
 0x122   :  { %v370_v46 = vmul.f32 0.5, %v368_v45 }
 0x124   :  { %407 = vtanh.f32 %v370_v46 }
 0x125   :  { %409 = vtanh.f32 %v367_v47 }
 0x131   :  { %v408_v48 = vpop.eup %407 }
 0x132   :  { %v372_v49 = vmul.f32 0.5, %v408_v48  ;;  %v410_v51 = vpop.eup %409 }
 0x134   :  { %v373_v50 = vadd.f32 0.5, %v372_v49 }
 0x136   :  { %v374_v52 = vmul.f32 %v410_v51, %v373_v50 }
 0x138   :  { %375 = vst [vmem:[#allocation13] sm:$0xff] %v374_v52 }
 0x139   :  { %542 = shalt.err (!%p539_p6)
}
 0x13a   :  { %385 = dma.vmem_to_hbm [thread:$0]  %s383_s30, 128, %s654_s7, [#allocation4]  }
 0x13b   :  { %559 = dma.done.wait [#allocation4], 128  }
 0x13c   :  { %560 = vsyncadd [#allocation4], 4294967168 }
 0x13d   :  { %389 = vsyncpa [#allocation3], 1 }
 0x13e   :  { %390 = vsyncpa [#allocation6], 1 }
 0x13f   :  { %391 = vsyncpa [#allocation9], 1 }
 0x140   :  { %392 = vsyncpa [#allocation12], 1 }
 0x141   :  { %393 = vsyncpa [#allocation4], 1 }

</bundles_post_ra>
